<compile_context>
chip_gen: v5e
topology: v5e:2x2
jax: 0.10.0
libtpu: 0.0.40
codegen_flags: <defaults>
</compile_context>

<pallas_src>
import functools
import math

import jax
import jax.numpy as jnp
from jax.experimental import pallas as pl
from jax.experimental.pallas import tpu as pltpu

_NEG_FLOOR = -1e30  # finite floor for the running max (avoids exp(-inf - -inf))


def _sdpa_kernel(inv_scale, has_mask, compute_dtype, live_ref, *refs):
    """One (tq x tk) attention block for a single (batch*head) slice."""
    if has_mask:
        mask_ref, q_ref, k_ref, v_ref, o_ref, m_sc, l_sc, acc_sc = refs
    else:
        q_ref, k_ref, v_ref, o_ref, m_sc, l_sc, acc_sc = refs
        mask_ref = None

    qi = pl.program_id(1)
    ki = pl.program_id(2)
    nk = pl.num_programs(2)

    prec = (jax.lax.Precision.HIGHEST
            if jnp.dtype(compute_dtype) == jnp.float32 else None)

    @pl.when(ki == 0)
    def _():
        m_sc[...] = jnp.full_like(m_sc, _NEG_FLOOR)
        l_sc[...] = jnp.zeros_like(l_sc)
        acc_sc[...] = jnp.zeros_like(acc_sc)

    live = live_ref[qi * nk + ki] != 0

    @pl.when(live)
    def _():
        # Fold 1/scaling into the q tile (baked immediate, tq*D VALU muls).
        q = (q_ref[...].astype(jnp.float32) * inv_scale).astype(compute_dtype)
        k = k_ref[...].astype(compute_dtype)
        # scores = (q/scaling) @ k^T : contraction over head dim, no transpose copy.
        s = jax.lax.dot_general(q, k, (((1,), (1,)), ((), ())),
                                precision=prec,
                                preferred_element_type=jnp.float32)
        if mask_ref is not None:
            s = s + mask_ref[...].astype(jnp.float32)

        # Online softmax update.
        m_prev = m_sc[...]
        m_new = jnp.maximum(m_prev, s.max(axis=-1, keepdims=True))
        alpha = jnp.exp(m_prev - m_new)
        p = jnp.exp(s - m_new)
        l_sc[...] = alpha * l_sc[...] + p.sum(axis=-1, keepdims=True)
        acc_sc[...] = alpha * acc_sc[...] + jax.lax.dot_general(
            p.astype(compute_dtype), v_ref[...].astype(compute_dtype),
            (((1,), (0,)), ((), ())),
            precision=prec, preferred_element_type=jnp.float32)
        m_sc[...] = m_new

    @pl.when(ki == nk - 1)
    def _():
        l = l_sc[...]
        r = pl.reciprocal(l, approx=True)   # EUP slot (nearly free)
        r = r * (2.0 - l * r)               # one Newton step -> ~exact f32 recip
        o_ref[...] = (acc_sc[...] * r).astype(o_ref.dtype)


def _pick_tile(dim, align, target):
    """Largest multiple of `align` dividing `dim` and <= `target`; else full dim."""
    if dim <= target:
        return dim
    t = (target // align) * align
    while t >= align:
        if dim % t == 0:
            return t
        t -= align
    return dim


def scaled_dot_product_attention(queries, keys, values, mask, scaling, *,
                                 tq_target=512, tk_target=512,
                                 compute_dtype=None):
    """Pallas equivalent of ScaledDotProductAttention(scaling).forward(...).

    `scaling` must be a static Python number (matching the nn.Module attribute).
    `compute_dtype=jnp.bfloat16` enables the MXU bf16 fast path on v6e/v7x.
    """
    B, H, Sq, D = queries.shape
    Sk = keys.shape[2]
    Dv = values.shape[3]
    BH = B * H

    qf = queries.reshape(BH, Sq, D)
    kf = keys.reshape(BH, Sk, D)
    vf = values.reshape(BH, Sk, Dv)

    # Tiles: sublane axis multiple of 8, lane axis multiple of 128 (or full extent).
    tq = _pick_tile(Sq, 8, tq_target)
    tk = _pick_tile(Sk, 128, tk_target)
    nq, nk = Sq // tq, Sk // tk
    grid = (BH, nq, nk)

    has_mask = mask is not None
    call_args = []
    in_specs = []

    if has_mask:
        # Keep the mask as-given (no broadcast materialization); fold the
        # batch/head broadcast into the index_map instead.
        if mask.ndim == 2:
            mf = mask.reshape(1, 1, Sq, Sk)
        elif mask.ndim == 3:
            mf = mask.reshape(mask.shape[0], 1, Sq, Sk)
        elif mask.ndim == 4:
            mf = mask
        else:
            raise ValueError(f"unsupported mask rank {mask.ndim}")
        mB, mH = mf.shape[0], mf.shape[1]
        if mB not in (1, B) or mH not in (1, H) or mf.shape[2:] != (Sq, Sk):
            raise ValueError(
                f"mask shape {mask.shape} not broadcastable to {(B, H, Sq, Sk)}")

        def mask_map(bh, qi, ki, live):
            b = bh // H if mB == B else 0
            h = bh % H if mH == H else 0
            return (b, h, qi, ki)

        # Block (qi, ki) can be skipped iff every mask entry in it is -inf for
        # every (batch, head): then p == 0 exactly for that block.
        red = mf.max(axis=(0, 1))                               # (Sq, Sk)
        blk_max = red.reshape(nq, tq, nk, tk).max(axis=(1, 3))  # (nq, nk)
        live_tab = (blk_max != -jnp.inf).astype(jnp.int32).reshape(nq * nk)

        in_specs.append(
            pl.BlockSpec((pl.Squeezed(), pl.Squeezed(), tq, tk), mask_map))
        call_args.append(mf)
    else:
        live_tab = jnp.ones((nq * nk,), dtype=jnp.int32)

    in_specs += [
        pl.BlockSpec((pl.Squeezed(), tq, D), lambda bh, qi, ki, live: (bh, qi, 0)),
        pl.BlockSpec((pl.Squeezed(), tk, D), lambda bh, qi, ki: (bh, ki, 0)
                     if False else (bh, ki, 0)),  # placeholder avoided below
    ]
    # (rewrite the k/v specs cleanly -- index maps take the prefetch ref too)
    in_specs = in_specs[:-1] + [
        pl.BlockSpec((pl.Squeezed(), tk, D), lambda bh, qi, ki, live: (bh, ki, 0)),
        pl.BlockSpec((pl.Squeezed(), tk, Dv), lambda bh, qi, ki, live: (bh, ki, 0)),
    ]
    call_args += [qf, kf, vf]

    cdt = jnp.dtype(compute_dtype) if compute_dtype is not None else queries.dtype
    inv_scale = 1.0 / float(scaling)   # static Python float -> baked immediate

    kernel = functools.partial(_sdpa_kernel, inv_scale, has_mask, cdt)

    out = pl.pallas_call(
        kernel,
        out_shape=jax.ShapeDtypeStruct((BH, Sq, Dv), queries.dtype),
        grid_spec=pltpu.PrefetchScalarGridSpec(
            num_scalar_prefetch=1,
            grid=grid,
            in_specs=in_specs,
            out_specs=pl.BlockSpec((pl.Squeezed(), tq, Dv),
                                   lambda bh, qi, ki, live: (bh, qi, 0)),
            scratch_shapes=[
                pltpu.VMEM((tq, 1), jnp.float32),    # running max m
                pltpu.VMEM((tq, 1), jnp.float32),    # running denom l
                pltpu.VMEM((tq, Dv), jnp.float32),   # output accumulator
            ],
        ),
        compiler_params=pltpu.CompilerParams(
            dimension_semantics=("parallel", "parallel", "arbitrary"),
            vmem_limit_bytes=48 * 1024 * 1024),
    )(live_tab, *call_args)

    return out.reshape(B, H, Sq, Dv)


def _reference(queries, keys, values, mask, scaling):
    """Pure-JAX reference matching the PyTorch module exactly."""
    s = jnp.einsum('bhqd,bhkd->bhqk', queries, keys,
                   precision=jax.lax.Precision.HIGHEST) / scaling
    if mask is not None:
        s = s + mask
    p = jax.nn.softmax(s, axis=-1)
    return jnp.einsum('bhqk,bhkd->bhqd', p, values,
                      precision=jax.lax.Precision.HIGHEST)


if __name__ == "__main__":
    key = jax.random.PRNGKey(0)
    kq, kk, kv = jax.random.split(key, 3)

    B, H, S, D = 2, 4, 8, 32
    scaling = math.sqrt(D)

    q = jax.random.normal(kq, (B, H, S, D), dtype=jnp.float32)
    k = jax.random.normal(kk, (B, H, S, D), dtype=jnp.float32)
    v = jax.random.normal(kv, (B, H, S, D), dtype=jnp.float32)

    # Additive causal mask: -inf strictly above the diagonal, 0 elsewhere.
    row = jnp.arange(S)[:, None]
    col = jnp.arange(S)[None, :]
    mask = jnp.where(col > row, -jnp.inf, 0.0).astype(jnp.float32)

    out = jax.block_until_ready(
        scaled_dot_product_attention(q, k, v, mask, scaling))
    ref = _reference(q, k, v, mask, scaling)
    assert out.shape == ref.shape == (B, H, S, D)
    assert bool(jnp.all(jnp.isfinite(out))), "non-finite values in output"
    assert bool(jnp.allclose(out, ref, atol=1e-5, rtol=1e-5)), \
        f"max abs err {float(jnp.max(jnp.abs(out - ref)))}"

    # mask=None specialization
    out2 = jax.block_until_ready(
        scaled_dot_product_attention(q, k, v, None, scaling))
    ref2 = _reference(q, k, v, None, scaling)
    assert bool(jnp.allclose(out2, ref2, atol=1e-5, rtol=1e-5)), \
        f"max abs err {float(jnp.max(jnp.abs(out2 - ref2)))}"

    print("KERNEL_OK")
</pallas_src>

<mosaic_0001>
module attributes {stable_mosaic.version = 11 : i64} {
  func.func @_sdpa_kernel(%arg0: i32, %arg1: i32, %arg2: i32, %arg3: memref<1xi32, #tpu.memory_space<smem>>, %arg4: memref<1x1x8x8xf32, #tpu.memory_space<vmem>>, %arg5: memref<1x8x32xf32, #tpu.memory_space<vmem>>, %arg6: memref<1x8x32xf32, #tpu.memory_space<vmem>>, %arg7: memref<1x8x32xf32, #tpu.memory_space<vmem>>, %arg8: memref<1x8x32xf32, #tpu.memory_space<vmem>>, %arg9: memref<8x1xf32, #tpu.memory_space<vmem>>, %arg10: memref<8x1xf32, #tpu.memory_space<vmem>>, %arg11: memref<8x32xf32, #tpu.memory_space<vmem>>) attributes {dimension_semantics = [#tpu.dimension_semantics<parallel>, #tpu.dimension_semantics<parallel>, #tpu.dimension_semantics<arbitrary>], iteration_bounds = array<i64: 8, 1, 1>, scalar_prefetch = 1 : i64, scratch_operands = 3 : i64, tpu.core_type = #tpu.core_type<tc>, window_params = [{transform_indices = @transform_0, window_bounds = array<i64: 1, 1, 8, 8>}, {transform_indices = @transform_1, window_bounds = array<i64: 1, 8, 32>}, {transform_indices = @transform_2, window_bounds = array<i64: 1, 8, 32>}, {transform_indices = @transform_3, window_bounds = array<i64: 1, 8, 32>}, {transform_indices = @transform_4, window_bounds = array<i64: 1, 8, 32>}]} {
    %c0_i32 = arith.constant 0 : i32
    %0 = arith.cmpi eq, %arg2, %c0_i32 : i32
    %1 = arith.extui %0 : i1 to i32
    %c0_i32_0 = arith.constant 0 : i32
    %2 = arith.cmpi ne, %1, %c0_i32_0 : i32
    scf.if %2 {
      %cst = arith.constant -1.000000e+30 : f32
      %13 = vector.broadcast %cst : f32 to vector<8x1xf32>
      %c0 = arith.constant 0 : index
      %c0_5 = arith.constant 0 : index
      %14 = vector.load %arg9[%c0, %c0_5] : memref<8x1xf32, #tpu.memory_space<vmem>>, vector<8x1xf32>
      tpu.vector_store %arg9[%c0, %c0_5], %13 {strides = array<i32>} : memref<8x1xf32, #tpu.memory_space<vmem>>, vector<8x1xf32>,
      %cst_6 = arith.constant 0.000000e+00 : f32
      %15 = vector.broadcast %cst_6 : f32 to vector<8x1xf32>
      %c0_7 = arith.constant 0 : index
      %c0_8 = arith.constant 0 : index
      %16 = vector.load %arg10[%c0_7, %c0_8] : memref<8x1xf32, #tpu.memory_space<vmem>>, vector<8x1xf32>
      tpu.vector_store %arg10[%c0_7, %c0_8], %15 {strides = array<i32>} : memref<8x1xf32, #tpu.memory_space<vmem>>, vector<8x1xf32>,
      %cst_9 = arith.constant 0.000000e+00 : f32
      %17 = vector.broadcast %cst_9 : f32 to vector<8x32xf32>
      %c0_10 = arith.constant 0 : index
      %c0_11 = arith.constant 0 : index
      %18 = vector.load %arg11[%c0_10, %c0_11] : memref<8x32xf32, #tpu.memory_space<vmem>>, vector<8x32xf32>
      tpu.vector_store %arg11[%c0_10, %c0_11], %17 {strides = array<i32>} : memref<8x32xf32, #tpu.memory_space<vmem>>, vector<8x32xf32>,
    } else {
    }
    %c1_i32 = arith.constant 1 : i32
    %3 = arith.muli %arg1, %c1_i32 : i32
    %4 = arith.addi %3, %arg2 : i32
    %5 = arith.index_cast %4 : i32 to index
    %6 = memref.load %arg3[%5] : memref<1xi32, #tpu.memory_space<smem>>
    %c0_i32_1 = arith.constant 0 : i32
    %7 = arith.cmpi ne, %6, %c0_i32_1 : i32
    %8 = arith.extui %7 : i1 to i32
    %c0_i32_2 = arith.constant 0 : i32
    %9 = arith.cmpi ne, %8, %c0_i32_2 : i32
    scf.if %9 {
      %c0 = arith.constant 0 : index
      %c0_5 = arith.constant 0 : index
      %c0_6 = arith.constant 0 : index
      %13 = vector.load %arg5[%c0, %c0_5, %c0_6] : memref<1x8x32xf32, #tpu.memory_space<vmem>>, vector<1x8x32xf32>
      %14 = vector.shape_cast %13 : vector<1x8x32xf32> to vector<8x32xf32>
      %cst = arith.constant 0.176776692 : f32
      %15 = vector.broadcast %cst : f32 to vector<8x32xf32>
      %16 = arith.mulf %14, %15 : vector<8x32xf32>
      %c0_7 = arith.constant 0 : index
      %c0_8 = arith.constant 0 : index
      %c0_9 = arith.constant 0 : index
      %17 = vector.load %arg6[%c0_7, %c0_8, %c0_9] : memref<1x8x32xf32, #tpu.memory_space<vmem>>, vector<1x8x32xf32>
      %18 = vector.shape_cast %17 : vector<1x8x32xf32> to vector<8x32xf32>
      %cst_10 = arith.constant dense<0.000000e+00> : vector<8x8xf32>
      %19 = tpu.matmul %16, %18, %cst_10 {dimension_numbers = #tpu.dot_dimension_numbers<[1], [1], [0], [0], [0, 0, 1, 0], [], []>, precision = #tpu.contract_precision<fp32>} : vector<8x32xf32>, vector<8x32xf32>, vector<8x8xf32> -> vector<8x8xf32>
      %c0_11 = arith.constant 0 : index
      %c0_12 = arith.constant 0 : index
      %c0_13 = arith.constant 0 : index
      %c0_14 = arith.constant 0 : index
      %20 = vector.load %arg4[%c0_11, %c0_12, %c0_13, %c0_14] : memref<1x1x8x8xf32, #tpu.memory_space<vmem>>, vector<1x1x8x8xf32>
      %21 = vector.shape_cast %20 : vector<1x1x8x8xf32> to vector<8x8xf32>
      %22 = arith.addf %19, %21 : vector<8x8xf32>
      %c0_15 = arith.constant 0 : index
      %c0_16 = arith.constant 0 : index
      %23 = vector.load %arg9[%c0_15, %c0_16] : memref<8x1xf32, #tpu.memory_space<vmem>>, vector<8x1xf32>
      %cst_17 = arith.constant dense<0xFF800000> : vector<8xf32>
      %24 = vector.multi_reduction <maximumf>, %22, %cst_17 [1] : vector<8x8xf32> to vector<8xf32>
      %25 = vector.shape_cast %24 : vector<8xf32> to vector<8x1xf32>
      %26 = arith.maximumf %23, %25 : vector<8x1xf32>
      %27 = arith.subf %23, %26 : vector<8x1xf32>
      %28 = math.exp %27 : vector<8x1xf32>
      %29 = vector.broadcast %26 : vector<8x1xf32> to vector<8x8xf32>
      %30 = arith.subf %22, %29 : vector<8x8xf32>
      %31 = math.exp %30 : vector<8x8xf32>
      %c0_18 = arith.constant 0 : index
      %c0_19 = arith.constant 0 : index
      %32 = vector.load %arg10[%c0_18, %c0_19] : memref<8x1xf32, #tpu.memory_space<vmem>>, vector<8x1xf32>
      %33 = arith.mulf %28, %32 : vector<8x1xf32>
      %cst_20 = arith.constant dense<0.000000e+00> : vector<8xf32>
      %34 = vector.multi_reduction <add>, %31, %cst_20 [1] : vector<8x8xf32> to vector<8xf32>
      %35 = vector.shape_cast %34 : vector<8xf32> to vector<8x1xf32>
      %36 = arith.addf %33, %35 : vector<8x1xf32>
      %c0_21 = arith.constant 0 : index
      %c0_22 = arith.constant 0 : index
      %37 = vector.load %arg10[%c0_21, %c0_22] : memref<8x1xf32, #tpu.memory_space<vmem>>, vector<8x1xf32>
      tpu.vector_store %arg10[%c0_21, %c0_22], %36 {strides = array<i32>} : memref<8x1xf32, #tpu.memory_space<vmem>>, vector<8x1xf32>,
      %c0_23 = arith.constant 0 : index
      %c0_24 = arith.constant 0 : index
      %38 = vector.load %arg11[%c0_23, %c0_24] : memref<8x32xf32, #tpu.memory_space<vmem>>, vector<8x32xf32>
      %39 = vector.broadcast %28 : vector<8x1xf32> to vector<8x32xf32>
      %40 = arith.mulf %39, %38 : vector<8x32xf32>
      %c0_25 = arith.constant 0 : index
      %c0_26 = arith.constant 0 : index
      %c0_27 = arith.constant 0 : index
      %41 = vector.load %arg7[%c0_25, %c0_26, %c0_27] : memref<1x8x32xf32, #tpu.memory_space<vmem>>, vector<1x8x32xf32>
      %42 = vector.shape_cast %41 : vector<1x8x32xf32> to vector<8x32xf32>
      %cst_28 = arith.constant dense<0.000000e+00> : vector<8x32xf32>
      %43 = tpu.matmul %31, %42, %cst_28 {dimension_numbers = #tpu.dot_dimension_numbers<[1], [0], [0], [1], [0, 0, 1, 1], [], []>, precision = #tpu.contract_precision<fp32>} : vector<8x8xf32>, vector<8x32xf32>, vector<8x32xf32> -> vector<8x32xf32>
      %44 = arith.addf %40, %43 : vector<8x32xf32>
      %c0_29 = arith.constant 0 : index
      %c0_30 = arith.constant 0 : index
      %45 = vector.load %arg11[%c0_29, %c0_30] : memref<8x32xf32, #tpu.memory_space<vmem>>, vector<8x32xf32>
      tpu.vector_store %arg11[%c0_29, %c0_30], %44 {strides = array<i32>} : memref<8x32xf32, #tpu.memory_space<vmem>>, vector<8x32xf32>,
      %c0_31 = arith.constant 0 : index
      %c0_32 = arith.constant 0 : index
      %46 = vector.load %arg9[%c0_31, %c0_32] : memref<8x1xf32, #tpu.memory_space<vmem>>, vector<8x1xf32>
      tpu.vector_store %arg9[%c0_31, %c0_32], %26 {strides = array<i32>} : memref<8x1xf32, #tpu.memory_space<vmem>>, vector<8x1xf32>,
    } else {
    }
    %c0_i32_3 = arith.constant 0 : i32
    %10 = arith.cmpi eq, %arg2, %c0_i32_3 : i32
    %11 = arith.extui %10 : i1 to i32
    %c0_i32_4 = arith.constant 0 : i32
    %12 = arith.cmpi ne, %11, %c0_i32_4 : i32
    scf.if %12 {
      %c0 = arith.constant 0 : index
      %c0_5 = arith.constant 0 : index
      %13 = vector.load %arg10[%c0, %c0_5] : memref<8x1xf32, #tpu.memory_space<vmem>>, vector<8x1xf32>
      %14 = tpu.reciprocal %13 {approx = true} : vector<8x1xf32> -> vector<8x1xf32>
      %15 = arith.mulf %13, %14 : vector<8x1xf32>
      %cst = arith.constant 2.000000e+00 : f32
      %16 = vector.broadcast %cst : f32 to vector<8x1xf32>
      %17 = arith.subf %16, %15 : vector<8x1xf32>
      %18 = arith.mulf %14, %17 : vector<8x1xf32>
      %c0_6 = arith.constant 0 : index
      %c0_7 = arith.constant 0 : index
      %19 = vector.load %arg11[%c0_6, %c0_7] : memref<8x32xf32, #tpu.memory_space<vmem>>, vector<8x32xf32>
      %20 = vector.broadcast %18 : vector<8x1xf32> to vector<8x32xf32>
      %21 = arith.mulf %19, %20 : vector<8x32xf32>
      %c0_8 = arith.constant 0 : index
      %c0_9 = arith.constant 0 : index
      %c0_10 = arith.constant 0 : index
      %22 = vector.load %arg8[%c0_8, %c0_9, %c0_10] : memref<1x8x32xf32, #tpu.memory_space<vmem>>, vector<1x8x32xf32>
      %23 = vector.shape_cast %22 : vector<1x8x32xf32> to vector<8x32xf32>
      %24 = vector.shape_cast %21 : vector<8x32xf32> to vector<1x8x32xf32>
      tpu.vector_store %arg8[%c0_8, %c0_9, %c0_10], %24 {strides = array<i32>} : memref<1x8x32xf32, #tpu.memory_space<vmem>>, vector<1x8x32xf32>,
    } else {
    }
    return
  }
  func.func @transform_0(%arg0: i32, %arg1: i32, %arg2: i32, %arg3: memref<1xi32, #tpu.memory_space<smem>>) -> (i32, i32, i32, i32) {
    %c0_i32 = arith.constant 0 : i32
    %c0_i32_0 = arith.constant 0 : i32
    %c0_i32_1 = arith.constant 0 : i32
    return %c0_i32, %c0_i32_0, %arg1, %arg2 : i32, i32, i32, i32
  }
  func.func @transform_1(%arg0: i32, %arg1: i32, %arg2: i32, %arg3: memref<1xi32, #tpu.memory_space<smem>>) -> (i32, i32, i32) {
    %c0_i32 = arith.constant 0 : i32
    %c0_i32_0 = arith.constant 0 : i32
    return %arg0, %arg1, %c0_i32 : i32, i32, i32
  }
  func.func @transform_2(%arg0: i32, %arg1: i32, %arg2: i32, %arg3: memref<1xi32, #tpu.memory_space<smem>>) -> (i32, i32, i32) {
    %c0_i32 = arith.constant 0 : i32
    %c0_i32_0 = arith.constant 0 : i32
    return %arg0, %arg2, %c0_i32 : i32, i32, i32
  }
  func.func @transform_3(%arg0: i32, %arg1: i32, %arg2: i32, %arg3: memref<1xi32, #tpu.memory_space<smem>>) -> (i32, i32, i32) {
    %c0_i32 = arith.constant 0 : i32
    %c0_i32_0 = arith.constant 0 : i32
    return %arg0, %arg2, %c0_i32 : i32, i32, i32
  }
  func.func @transform_4(%arg0: i32, %arg1: i32, %arg2: i32, %arg3: memref<1xi32, #tpu.memory_space<smem>>) -> (i32, i32, i32) {
    %c0_i32 = arith.constant 0 : i32
    %c0_i32_0 = arith.constant 0 : i32
    return %arg0, %arg1, %c0_i32 : i32, i32, i32
  }
}

</mosaic_0001>

<bundles_post_ra>
// kernel: tpu_custom_call.1
= control target key start
LH: loop header
LB: loop body
LE: loop exit
PB: predicated region body
PF: predicated region fallthrough
CT: control target
= control target key end

     0   :  { %s1462_s0 = inlined_call_operand.<no memory space> [shape: s32[1], index: 0, kind: input, shape index: {}]   ;;  %s1463_s1 = inlined_call_operand.hbm [shape: f32[1,1,8,8], index: 1, kind: input, shape index: {}]   ;;  %s1464_s2 = inlined_call_operand.hbm [shape: f32[8,8,32], index: 2, kind: input, shape index: {}]   ;;  %s1465_s3 = inlined_call_operand.hbm [shape: f32[8,8,32], index: 3, kind: input, shape index: {}]   ;;  %s1466_s4 = inlined_call_operand.hbm [shape: f32[8,8,32], index: 4, kind: input, shape index: {}]   ;;  %s1467_s5 = inlined_call_operand.hbm [shape: f32[8,8,32], index: 5, kind: output, shape index: {}]  }
   0x1   :  { %1471 = sst [smem:[#allocation22_spill]] %s1463_s1 }
   0x2   :  { %1472 = sst [smem:[#allocation23_spill]] %s1464_s2 }
   0x3   :  { %1473 = sst [smem:[#allocation24_spill]] %s1465_s3 }
   0x4   :  { %10 = sst [smem:[#allocation6]] %s1462_s0 }
   0x5   :  { %11 = vsyncpa [#allocation8], 0 }
   0x6   :  { %12 = vsyncpa [#allocation11], 0 }
   0x7   :  { %14 = vsyncpa [#allocation11 + $0x1], 0 }
   0x8   :  { %15 = vsyncpa [#allocation14], 0 }
   0x9   :  { %17 = vsyncpa [#allocation14 + $0x1], 0 }
   0xa   :  { %18 = vsyncpa [#allocation9], 0 }
   0xb   :  { %20 = vsyncpa [#allocation9 + $0x1], 0  ;;  %s1249_s20 = smov 0   ;;  %s1251_s21 = smov 0  }
   0xc   :  { %s1253_s22 = smov 0   ;;  %s1255_s23 = smov 0  }
   0xd   :  { %s1257_s24 = smov 0   ;;  %s1259_s25 = smov 0  }
   0xe LB: > { %1474 = sst [smem:[#allocation20_spill]] %s1205_s24  ;;  %s45_s0 = sadd.s32 1, %s1205_s24  ;;  %s1209_s25 = sphi %s1259_s25, %s26_s25   ;;  %s1205_s24 = sphi %s1257_s24, %s1487_s24   ;;  %s1201_s23 = sphi %s1255_s23, %s1486_s23   ;;  %s1197_s22 = sphi %s1253_s22, %s1490_s22   ;;  %s1193_s21 = sphi %s1251_s21, %s1489_s21   ;;  %s1189_s20 = sphi %s1249_s20, %s1488_s20  }
   0xf   : > { %s82_s26 = sadd.s32 1, %s1197_s22  ;;  %p47_p0 = scmp.ge.s32.totalorder %s45_s0, 8 }
  0x10   : > { %p89_p1 = scmp.ne.s32.totalorder %s1197_s22, %s1193_s21  ;;  %p90_p2 = scmp.eq.s32.totalorder %s1209_s25, 0 }
  0x11   : > { %s1492_s0 = smov (%p47_p0, %s45_s0), 0  ;;  %p934_p4 = scmp.lt.s32.totalorder %s1209_s25, 8 }
  0x12   : > { %1475 = sst [smem:[#allocation21_spill]] %s1492_s0  ;;  %p1289_p3 = por %p90_p2, %p89_p1 }
  0x13   : > { %s77_s28 = ssub.s32 %s1205_s24, %s1492_s0  ;;  %s218_s29 = sand.u32 1, %s1209_s25  }
  0x14   : > { %p80_p5 = scmp.eq.s32.totalorder %s77_s28, 0  ;;  %s1468_s30 = sand.u32 1, %s1197_s22  }
  0x15   : > { %s1299_s6 = sshll.u32 %s1205_s24, 3  ;;  %s1306_s8 = sshll.u32 %s1468_s30, 3 }
  0x16   : > { %s1302_s7 = scalar_select %p80_p5, %s1197_s22, %s82_s26  }
  0x17   : > { %s1477_s2 = sld [smem:[#allocation23_spill]]  ;;  %s222_s13 = scalar_lea.vmem [#allocation10], %s1306_s8 }
  0x18   : > { %s231_s14 = sshll.u32 %s222_s13, 4  ;;  %p1317_p6 = pnand %p934_p4, %p1289_p3  ;;  %s232_s14 = int_to_ptr.vmem [resolvable:$true] %s231_s14 }
  0x19   : > { %s1321_s16 = scalar_lea.sflag [#allocation11], %s218_s29  ;;  %s1327_s17 = sadd.s32 4294967295, %s1209_s25  }
  0x1a   : > { %s882_s18 = sadd.s32 4294967294, %s1209_s25   ;;  %p95_p7 = scmp.ne.s32.totalorder %s1193_s21, %s1189_s20 }
  0x1b   : > { %p96_p8 = scmp.eq.s32.totalorder %s1327_s17, 0  ;;  %p177_p9 = scmp.eq.s32.totalorder %s1327_s17, 7 }
  0x1c   : > { %p183_p10 = scmp.eq.s32.totalorder %s882_s18, 7  ;;  %p883_p11 = scmp.ge.s32.totalorder %s1209_s25, 1 }
  0x1d   : > { %s227_s11 = scalar_lea.hbm %s1477_s2, %s1299_s6  ;;  %p1337_p12 = por %p96_p8, %p95_p7 }
  0x1e   : > { %s229_s12 = sshll.u32 %s227_s11, 4  ;;  %p1344_p13 = por %p177_p9, %p89_p1  ;;  %s230_s12 = int_to_ptr.hbm [resolvable:$true] %s229_s12 }
  0x1f   : > { %922 = dma.hbm_to_vmem [thread:$0]  (!%p1317_p6), %s230_s12, 128, %s232_s14, %s1321_s16  }
  0x20   : > { %p1348_p0 = por %p183_p10, %p95_p7  ;;  %p190_p2 = scmp.lt.s32.totalorder %s1209_s25, 9 }
  0x21   : > { %s1482_s1 = sld [smem:[#allocation22_spill]]  ;;  %s1211_s11 = smov [#allocation7]  }
  0x22   : > { %p1356_p3 = pnand %p883_p11, %p190_p2  ;;  %s207_s12 = sshll.u32 %s1211_s11, 4  ;;  %s208_s12 = int_to_ptr.vmem [resolvable:$true] %s207_s12 }
  0x23   : > { %s1484_s3 = sld [smem:[#allocation24_spill]]  ;;  %s242_s29 = scalar_lea.vmem [#allocation12], %s1306_s8 }
  0x24   : > { %p915_p1 = pneg %p1356_p3  ;;  %s251_s30 = sshll.u32 %s242_s29, 4  ;;  %s252_s30 = int_to_ptr.vmem [resolvable:$true] %s251_s30 }
  0x25   : > { %s267_s11 = scalar_lea.hbm %s1466_s4, %s1299_s6  ;;  %s262_s0 = scalar_lea.vmem [#allocation13], %s1306_s8 }
  0x26   : > { %p916_p4 = pnand %p915_p1, %p96_p8  ;;  %s271_s24 = sshll.u32 %s262_s0, 4  ;;  %s272_s24 = int_to_ptr.vmem [resolvable:$true] %s271_s24 }
  0x27   : > { %s205_s9 = sshll.u32 %s1482_s1, 4  ;;  %s269_s13 = sshll.u32 %s267_s11, 4  ;;  %s206_s9 = int_to_ptr.hbm [resolvable:$true] %s205_s9  ;;  %s270_s13 = int_to_ptr.hbm [resolvable:$true] %s269_s13 }
  0x28   : > { %918 = dma.hbm_to_vmem [thread:$0]  (!%p916_p4), %s206_s9, 128, %s208_s12, [#allocation8]  }
  0x29   : > { %s247_s18 = scalar_lea.hbm %s1484_s3, %s1299_s6  ;;  %s1485_s14 = sand.u32 1, %s1197_s22  }
  0x2a   : > { %s249_s28 = sshll.u32 %s247_s18, 4  ;;  %s259_s3 = scalar_lea.sflag [#allocation14], %s1485_s14  ;;  %s250_s28 = int_to_ptr.hbm [resolvable:$true] %s249_s28 }
  0x2b   : > { %925 = dma.hbm_to_vmem [thread:$0]  (!%p1317_p6), %s250_s28, 128, %s252_s30, %s1321_s16  }
  0x2c   : > { %928 = dma.hbm_to_vmem [thread:$0]  (!%p1317_p6), %s270_s13, 128, %s272_s24, %s259_s3  }
  0x2d   : > { %280 = sbr.rel (%p1356_p3) target bundleno = 760 (0x2f8), region = 36 }
  0x32   : > { %1172 = dma.done.wait (%p96_p8), [#allocation8], 128  }
  0x33   : > { %1174 = vsyncadd (%p96_p8), [#allocation8], 4294967168  ;;  %s287_s1 = sand.u32 1, %s1327_s17   ;;  %s1389_s2 = sand.u32 1, %s1193_s21  }
  0x34   : > { %s1392_s0 = sshll.u32 %s1389_s2, 3  ;;  %s288_s3 = scalar_lea.sflag [#allocation11], %s287_s1 }
  0x35   : > { %s291_s24 = scalar_lea.vmem [#allocation10], %s1392_s0 }
  0x36   : > { %1176 = dma.done.wait (%p1337_p12), %s288_s3, 256  }
  0x37   : > { %1178 = vsyncadd (%p1337_p12), %s288_s3, 4294967040  ;;  %s301_s30 = scalar_lea.vmem [#allocation12], %s1392_s0  ;;  %s308_s6 = scalar_lea.sflag [#allocation14], %s1389_s2 }
  0x38   : > { %s311_s8 = scalar_lea.vmem [#allocation13], %s1392_s0 }
  0x39   : > { %1180 = dma.done.wait (%p1337_p12), %s308_s6, 128  }
  0x3a   : > { %1182 = vsyncadd (%p1337_p12), %s308_s6, 4294967168  ;;  %vm351_vm0 = vcmask 7168   ;;  %s357_s15 = sld [smem:[#allocation6]]  ;;  %v1212_v0 = vmov -1e+30   ;;  %vm354_vm1 = vcmask 261120  }
  0x3b   : > { %352 = vst.msk [vmem:[#allocation2] sm:$0xff] %vm351_vm0, %v1212_v0  ;;  %v1213_v1 = vmov 0.0   ;;  %s346_s16 = scalar_lea.vmem [#allocation15], %s1392_s0 }
  0x3c   : > { %353 = vst.msk [vmem:[#allocation3] sm:$0xff] %vm351_vm0, %v1213_v1 }
  0x3d   : > { %355 = vst.msk [vmem:[#allocation4] sm:$0xff] %vm354_vm1, %v1213_v1 }
  0x40   : > { %p898_p5 = scmp.eq.s32.totalorder %s357_s15, 0 }
  0x42   : > { %361 = sbr.rel (%p898_p5) target bundleno = 626 (0x272), region = 60 }
  0x47   : > { %v364_v2 = vld [vmem:[%s301_s30] sm:$0xff]  ;;  %v362_v3 = vld [vmem:[%s291_s24] sm:$0xff]  ;;  %vm520_vm2 = vcmask 64512   ;;  %v1214_v31 = vmov 0  }
  0x48   : > { %v371_v4 = vsel %vm354_vm1, %v364_v2, 0  ;;  %v363_v5 = vmul.f32 0.17677669, %v362_v3  ;;  %v365_v17 = vld [vmem:[#allocation7] sm:$0xff]  ;;  %990 = vset.pattern.permute.xlu0 %v1214_v31  ;;  %991 = vset.pattern.permute.xlu1 %v1214_v31  ;;  %v519_v32 = vld [vmem:[#allocation2] sm:$0xff]  ;;  %v536_v56 = vld [vmem:[#allocation3] sm:$0xff] }
  0x49   : > { %v388_v6 = vand.u32 4294901760, %v371_v4  ;;  %v551_v38 = vld [vmem:[%s311_s8] sm:$0xff]  ;;  %v544_v3 = vld [vmem:[#allocation4] sm:$0xff] }
  0x4a   : > { %v368_v7 = vsel %vm354_vm1, %v363_v5, 0  ;;  %v570_v39 = vand.u32 4294901760, %v551_v38 }
  0x4b   : > { %v415_v8 = vsub.f32 %v371_v4, %v388_v6  ;;  %389 = vmatpush.xpose.msra.mxu0 %v388_v6  ;;  %465 = vmatpush.xpose.msra.mxu3 %v388_v6  ;;  %v390_v9 = vand.u32 4294901760, %v368_v7 }
  0x4c   : > { %v597_v40 = vsub.f32 %v551_v38, %v570_v39 }
  0x4d   : > { %442 = vmatpush.xpose.msra.mxu2 %v415_v8  ;;  %v391_v10 = vsub.f32 %v368_v7, %v390_v9  ;;  %v416_v11 = vand.u32 4294901760, %v415_v8 }
  0x4e   : > { %v598_v41 = vand.u32 4294901760, %v597_v40 }
  0x4f   : > { %v417_v12 = vsub.f32 %v415_v8, %v416_v11  ;;  %v392_v13 = vand.u32 4294901760, %v391_v10  ;;  %491 = vmatpush.xpose.msrb.mxu0 %v416_v11 }
  0x50   : > { %445 = vmatmul.f32.vlgmr.msra.gmra.mxu2 %v391_v10  ;;  %v599_v42 = vsub.f32 %v597_v40, %v598_v41 }
  0x51   : > { %v418_v14 = vand.u32 4294901760, %v417_v12  ;;  %v393_v15 = vsub.f32 %v391_v10, %v392_v13  ;;  %469 = vmatmul.f32.vlgmr.msra.gmra.mxu3 %v392_v13  ;;  %571 = vmatpush.msrb.mxu2 %v570_v39 }
  0x52   : > { %v600_v43 = vand.u32 4294901760, %v599_v42 }
  0x53   : > { %419 = vmatpush.xpose.msra.mxu1 %v418_v14  ;;  %v394_v16 = vand.u32 4294901760, %v393_v15  ;;  %673 = vmatpush.msra.mxu2 %v598_v41 }
  0x54   : > { %601 = vmatpush.msrb.mxu3 %v600_v43 }
  0x55   : > { %395 = vmatmul.f32.vlgmr.msra.gmra.mxu0 %v394_v16 }
  0x56   : > { %421 = vmatmul.f32.vlgmr.msra.gmra.mxu1 %v390_v9  ;;  %624 = vmatpush.msra.mxu0 %v597_v40 }
  0x57   : > { %513 = vmatpush.xpose.msrb.mxu1 %v388_v6  ;;  %695 = vmatpush.msra.mxu3 %v570_v39 }
  0x5b   : > { %647 = vmatpush.msra.mxu1 %v570_v39 }
  0x5d   : > { %493 = vmatmul.f32.vlgmr.msrb.gmra.mxu0 %v390_v9 }
  0x5e   : > { %515 = vmatmul.f32.vlgmr.msrb.gmra.mxu1 %v390_v9 }
  0xd2   : > { %v396_v18 = vpop.f32.mrf.mxu0 }
  0xd3   : > { %v397_v19 = vadd.f32 %v396_v18, %v365_v17  ;;  %v422_v20 = vpop.f32.mrf.mxu1  ;;  %v446_v21 = vpop.f32.mrf.mxu2 }
  0xd4   : > { %v470_v23 = vpop.f32.mrf.mxu3 }
  0xd5   : > { %v423_v22 = vadd.f32 %v422_v20, %v397_v19 }
  0xd7   : > { %v447_v24 = vadd.f32 %v446_v21, %v423_v22 }
  0xd9   : > { %v471_v25 = vadd.f32 %v470_v23, %v447_v24 }
  0xda   : > { %v494_v26 = vpop.f32.mrf.mxu0 }
  0xdb   : > { %v495_v27 = vadd.f32 %v494_v26, %v471_v25  ;;  %v516_v28 = vpop.f32.mrf.mxu1 }
  0xdd   : > { %v517_v29 = vadd.f32 %v516_v28, %v495_v27 }
  0xdf   : > { %v521_v30 = vsel %vm520_vm2, %v517_v29, -inf }
  0xe0   : > { %522 = vmax.xlane.f32.xlu0 %v521_v30 }
 0x153   : > { %v523_v33 = vpop.xlane.xlu0 %522 }
 0x154   : > { %v524_v34 = vmax.f32 %v519_v32, %v523_v33 }
 0x156   : > { %v525_v35 = vsub.f32 %v519_v32, %v524_v34  ;;  %703 = vst.msk [vmem:[#allocation2] sm:$0xff] %vm351_vm0, %v524_v34  ;;  %530 = vperm.xlu0 %990, %v524_v34  }
 0x158   : > { %v526_v36 = vmul.f32 1.442695, %v525_v35 }
 0x15a   : > { %992 = vpow2.f32 %v526_v36 }
 0x160   : > { %v993_v37 = vpop.eup %992 }
 0x161   : > { %547 = vperm.xlu1 %991, %v993_v37   ;;  %v537_v57 = vmul.f32 %v993_v37, %v536_v56 }
 0x1c8   : > { %v531_v44 = vpop.permute.xlu0 %530 }
 0x1c9   : > { %v533_v45 = vsub.f32 %v517_v29, %v531_v44 }
 0x1cb   : > { %v534_v46 = vmul.f32 1.442695, %v533_v45 }
 0x1cd   : > { %994 = vpow2.f32 %v534_v46 }
 0x1d3   : > { %v995_v47 = vpop.eup %994  ;;  %v548_v55 = vpop.permute.xlu1 %547 }
 0x1d4   : > { %v538_v48 = vsel %vm520_vm2, %v995_v47, 0.0  ;;  %v553_v49 = vsel %vm520_vm2, %v995_v47, 0  ;;  %v550_v7 = vmul.f32 %v548_v55, %v544_v3 }
 0x1d5   : > { %539 = vadd.xlane.f32.xlu1 %v538_v48  ;;  %v572_v50 = vand.u32 4294901760, %v553_v49 }
 0x1d7   : > { %603 = vmatmul.f32.vlgmr.msrb.gmra.mxu3 %v572_v50  ;;  %v573_v51 = vsub.f32 %v553_v49, %v572_v50 }
 0x1d9   : > { %627 = vmatmul.f32.vlgmr.msra.gmra.mxu0 %v573_v51  ;;  %v574_v52 = vand.u32 4294901760, %v573_v51 }
 0x1db   : > { %651 = vmatmul.f32.vlgmr.msra.gmra.mxu1 %v574_v52  ;;  %v575_v53 = vsub.f32 %v573_v51, %v574_v52 }
 0x1dd   : > { %v576_v54 = vand.u32 4294901760, %v575_v53 }
 0x1df   : > { %577 = vmatmul.f32.vlgmr.msrb.gmra.mxu2 %v576_v54  ;;  %697 = vmatmul.f32.vlgmr.msra.gmra.mxu3 %v572_v50 }
 0x1e7   : > { %675 = vmatmul.f32.vlgmr.msra.gmra.mxu2 %v572_v50 }
 0x248   : > { %v540_v58 = vpop.xlane.xlu1 %539 }
 0x249   : > { %v541_v59 = vadd.f32 %v540_v58, %v537_v57 }
 0x24b   : > { %543 = vst.msk [vmem:[#allocation3] sm:$0xff] %vm351_vm0, %v541_v59 }
 0x256   : > { %v628_v63 = vpop.f32.mrf.mxu0 }
 0x258   : > { %v652_v1 = vpop.f32.mrf.mxu1 }
 0x25a   : > { %v604_v60 = vpop.f32.mrf.mxu3 }
 0x262   : > { %v578_v61 = vpop.f32.mrf.mxu2  ;;  %v698_v6 = vpop.f32.mrf.mxu3 }
 0x263   : > { %v605_v62 = vadd.f32 %v604_v60, %v578_v61 }
 0x265   : > { %v629_v0 = vadd.f32 %v628_v63, %v605_v62 }
 0x267   : > { %v653_v2 = vadd.f32 %v652_v1, %v629_v0 }
 0x26a   : > { %v676_v4 = vpop.f32.mrf.mxu2 }
 0x26b   : > { %v677_v5 = vadd.f32 %v676_v4, %v653_v2 }
 0x26d   : > { %v699_v8 = vadd.f32 %v698_v6, %v677_v5 }
 0x26f   : > { %v701_v9 = vadd.f32 %v699_v8, %v550_v7 }
 0x271   : > { %702 = vst.msk [vmem:[#allocation4] sm:$0xff] %vm354_vm1, %v701_v9 }
 0x272 PF: > { %v707_v10 = vld [vmem:[#allocation3] sm:$0xff]  ;;  %v1215_v11 = vmov 0   ;;  %s900_s17 = sshll.u32 %s1201_s23, 3  ;;  %s735_s12 = sshll.u32 %s346_s16, 4  ;;  %s736_s12 = int_to_ptr.vmem [resolvable:$true] %s735_s12 }
 0x273   : > { %996 = vset.pattern.permute.xlu0 %v1215_v11  ;;  %997 = vrcp.f32 %v707_v10  ;;  %s733_s10 = scalar_lea.hbm %s1467_s5, %s900_s17  ;;  %s722_s28 = scalar_lea.sflag [#allocation9], %s1389_s2 }
 0x274   : > { %s737_s18 = sshll.u32 %s733_s10, 4  ;;  %s1139_s14 = scalar_lea.hbm %s1467_s5, 64  ;;  %s738_s18 = int_to_ptr.hbm [resolvable:$true] %s737_s18 }
 0x275   : > { %s1133_s29 = sshra.s32 %s738_s18, 4  ;;  %s1134_s29 = int_to_ptr.hbm [resolvable:$true] %s1133_s29 }
 0x276   : > { %s1135_s11 = scalar_lea.hbm %s1134_s29, 8  ;;  %p1140_p9 = scmp.lt.s32.totalorder %s1134_s29, %s1467_s5 }
 0x277   : > { %p1136_p6 = scmp.ne.s32.totalorder %s1134_s29, %s1135_s11  ;;  %p1141_p10 = scmp.lt.s32.totalorder %s1139_s14, %s1135_s11 }
 0x278   : > { %v712_v16 = vld [vmem:[#allocation4] sm:$0xff] }
 0x279   : > { %v998_v12 = vpop.eup %997  ;;  %p1137_p7 = pnand %p1136_p6, %p1344_p13  ;;  %p1142_p11 = por %p1141_p10, %p1140_p9 }
 0x27a   : > { %v709_v13 = vmul.f32 %v998_v12, %v707_v10 }
 0x27b   : > { %p1138_p8 = pneg %p1137_p7 }
 0x27c   : > { %v710_v14 = vsub.f32 2.0, %v709_v13 }
 0x27d   : > { %p1143_p12 = pnand %p1142_p11, %p1138_p8 }
 0x27e   : > { %v711_v15 = vmul.f32 %v998_v12, %v710_v14 }
 0x280   : > { %715 = vperm.xlu0 %996, %v711_v15  }
 0x2f2   : > { %v716_v17 = vpop.permute.xlu0 %715 }
 0x2f3   : > { %v718_v18 = vmul.f32 %v716_v17, %v712_v16 }
 0x2f5   : > { %720 = vst.msk [vmem:[%s346_s16] sm:$0xff] %vm354_vm1, %v718_v18 }
 0x2f6   : > { %1146 = shalt.err (!%p1143_p12)
}
 0x2f7   : > { %913 = dma.vmem_to_hbm [thread:$0]  (%p1344_p13), %s736_s12, 128, %s738_s18, %s722_s28  }
 0x2f8 PF: > { %p936_p2 = scmp.ge.s32.totalorder %s1209_s25, 2  ;;  %s749_s2 = sand.u32 1, %s1189_s20  }
 0x2f9   : > { %s750_s0 = scalar_lea.sflag [#allocation9], %s749_s2 }
 0x2fa   : > { %p930_p3 = pnand %p936_p2, %p1348_p0 }
 0x2fc   : > { %p931_p1 = pneg %p930_p3 }
 0x2fe   : > { %1184 = dma.done.wait (%p931_p1), %s750_s0, 128  }
 0x2ff   : > { %1186 = vsyncadd (%p931_p1), %s750_s0, 4294967168  ;;  %s26_s25 = sadd.s32 1, %s1209_s25   ;;  %s1486_s23 = sld [smem:[#allocation20_spill]] }
 0x300   : > { %p23_p4 = scmp.ge.s32.totalorder %s26_s25, 10   ;;  %s1487_s24 = sld [smem:[#allocation21_spill]] }
 0x301   : > { %s1488_s20 = smov %s1193_s21  ;;  %s1489_s21 = smov %s1197_s22 }
 0x302   : > { %s1490_s22 = smov %s1302_s7  ;;  %25 = sbr.rel (!%p23_p4) target bundleno = 14 (0xe), region = 123 }
 0x307   :  { %756 = vsyncpa [#allocation8], 1 }
 0x308   :  { %758 = vsyncpa [#allocation8 + $0x1], 1 }
 0x309   :  { %759 = vsyncpa [#allocation11], 1 }
 0x30a   :  { %761 = vsyncpa [#allocation11 + $0x1], 1 }
 0x30b   :  { %762 = vsyncpa [#allocation14], 1 }
 0x30c   :  { %764 = vsyncpa [#allocation14 + $0x1], 1 }
 0x30d   :  { %765 = vsyncpa [#allocation9], 1 }
 0x30e   :  { %767 = vsyncpa [#allocation9 + $0x1], 1 }

</bundles_post_ra>
